<compile_context>
chip_gen: v7x
topology: tpu7x:2x2x1
jax: 0.10.0
libtpu: 0.0.40
codegen_flags: <defaults>
</compile_context>

<pallas_src>
import jax
import jax.numpy as jnp
from jax.experimental import pallas as pl
from jax.experimental.pallas import tpu as pltpu


def _reward_model_kernel(latent_ref, w_ref, b_ref, out_ref):
    """One [TB, pack*L] @ [pack*L, 2*pack] MXU pass + f32 bias + sigmoid."""
    z = jnp.dot(latent_ref[...], w_ref[...],
                preferred_element_type=jnp.float32)          # [TB, 2*pack] f32
    z = z + b_ref[...]                                       # broadcast [1, 2*pack] f32
    out_ref[...] = jax.nn.sigmoid(z).astype(out_ref.dtype)   # EUP exp, bounded


def prepare_reward_model_params(w_r, b_r, w_d, b_d, *, pack=4, dtype=jnp.float32):
    """Build packed params ONCE (outside the forward hot path).

    w_r, w_d: [L, 1] (transposed vs. torch's [1, L]); b_r, b_d: [1, 1].
    Returns:
      w_packed: [pack*L, 2*pack] block-diagonal weight = kron(I_pack, [W_r W_d])
      b_packed: [1, 2*pack] = tile([b_r, b_d], pack), kept in float32 (epilogue)
    """
    L = w_r.shape[0]
    w_fused = jnp.concatenate([w_r.reshape(L, 1), w_d.reshape(L, 1)],
                              axis=1).astype(jnp.float32)        # [L, 2]
    b_fused = jnp.concatenate([b_r.reshape(1, 1), b_d.reshape(1, 1)],
                              axis=1).astype(jnp.float32)        # [1, 2]
    w_packed = jnp.kron(jnp.eye(pack, dtype=jnp.float32), w_fused)  # [pack*L, 2*pack]
    b_packed = jnp.tile(b_fused, (1, pack))                          # [1, 2*pack]
    return w_packed.astype(dtype), b_packed                          # bias stays f32


def reward_model_forward(latent, w_packed, b_packed, *, block_rows: int = 2048):
    """Forward pass. latent: [B, L]; packed params from prepare_reward_model_params.

    Returns (reward, discount), each [B, 1] float32.
    Requires B % pack == 0 (prepare with pack=1 for arbitrary B).
    """
    B, L = latent.shape
    n_out = b_packed.shape[1]
    pack = n_out // 2
    K = w_packed.shape[0]
    assert K == pack * L, f"weight rows {K} != pack*L = {pack}*{L}"
    assert B % pack == 0, f"batch {B} must be a multiple of pack={pack}"

    rows = B // pack
    latent_p = latent.reshape(rows, K)   # row-major contiguous -> free metadata reshape

    # Batch tile: whole array if it fits one tile (no ragged block at all),
    # otherwise block_rows (multiple of 8) with a ragged last block.
    tb = rows if rows <= block_rows else block_rows
    grid = (pl.cdiv(rows, tb),)

    out = pl.pallas_call(
        _reward_model_kernel,
        out_shape=jax.ShapeDtypeStruct((rows, n_out), jnp.float32),
        grid=grid,
        in_specs=[
            pl.BlockSpec((tb, K), lambda i: (i, 0)),      # packed latent tile (pipelined)
            pl.BlockSpec((K, n_out), lambda i: (0, 0)),   # block-diag weights, resident
            pl.BlockSpec((1, n_out), lambda i: (0, 0)),   # fused biases, resident
        ],
        out_specs=pl.BlockSpec((tb, n_out), lambda i: (i, 0)),
        compiler_params=pltpu.CompilerParams(
            dimension_semantics=("parallel",),
        ),
    )(latent_p, w_packed, b_packed)

    out = out.reshape(B, 2)              # free metadata reshape
    return out[:, 0:1], out[:, 1:2]


def init_linear_params(key, in_features, out_features):
    """torch.nn.Linear default init (U[-1/sqrt(in), 1/sqrt(in)]).

    Returns weight [in_features, out_features] (transposed vs torch) and
    bias [1, out_features].
    """
    kw, kb = jax.random.split(key)
    bound = 1.0 / jnp.sqrt(jnp.float32(in_features))
    w = jax.random.uniform(kw, (in_features, out_features), jnp.float32,
                           minval=-bound, maxval=bound)
    b = jax.random.uniform(kb, (1, out_features), jnp.float32,
                           minval=-bound, maxval=bound)
    return w, b


if __name__ == "__main__":
    latent_size = 32
    hidden_size = 32   # `hidden` is unused by the forward pass (matches PyTorch module)
    batch = 8

    root = jax.random.PRNGKey(0)
    k_latent, k_hidden, k_r, k_d = jax.random.split(root, 4)

    latent = jax.random.normal(k_latent, (batch, latent_size), jnp.float32)
    hidden = jax.random.normal(k_hidden, (batch, hidden_size), jnp.float32)  # unused

    w_r, b_r = init_linear_params(k_r, latent_size, 1)   # reward head
    w_d, b_d = init_linear_params(k_d, latent_size, 1)   # discount head

    # One-time param packing (outside the forward hot path).
    w_packed, b_packed = prepare_reward_model_params(w_r, b_r, w_d, b_d, pack=4)

    fwd = jax.jit(reward_model_forward)
    reward, discount = fwd(latent, w_packed, b_packed)
    jax.block_until_ready((reward, discount))

    # Pure-JAX reference check.
    ref_r = jax.nn.sigmoid(latent @ w_r + b_r)
    ref_d = jax.nn.sigmoid(latent @ w_d + b_d)
    assert reward.shape == (batch, 1) and discount.shape == (batch, 1)
    assert jnp.allclose(reward, ref_r, atol=1e-5, rtol=1e-5)
    assert jnp.allclose(discount, ref_d, atol=1e-5, rtol=1e-5)

    print("KERNEL_OK")
</pallas_src>

<mosaic_0001>
module attributes {stable_mosaic.version = 11 : i64} {
  func.func @_reward_model_kernel(%arg0: i32, %arg1: memref<2x128xf32, #tpu.memory_space<vmem>>, %arg2: memref<128x8xf32, #tpu.memory_space<vmem>>, %arg3: memref<1x8xf32, #tpu.memory_space<vmem>>, %arg4: memref<2x8xf32, #tpu.memory_space<vmem>>) attributes {dimension_semantics = [#tpu.dimension_semantics<parallel>], iteration_bounds = array<i64: 1>, scalar_prefetch = 0 : i64, scratch_operands = 0 : i64, tpu.core_type = #tpu.core_type<tc>, window_params = [{transform_indices = @transform_0, window_bounds = array<i64: 2, 128>}, {pipeline_mode = #tpu.pipeline_mode<synchronous>, transform_indices = @transform_1, window_bounds = array<i64: 128, 8>}, {pipeline_mode = #tpu.pipeline_mode<synchronous>, transform_indices = @transform_2, window_bounds = array<i64: 1, 8>}, {transform_indices = @transform_3, window_bounds = array<i64: 2, 8>}]} {
    %c0 = arith.constant 0 : index
    %c0_0 = arith.constant 0 : index
    %0 = vector.load %arg1[%c0, %c0_0] : memref<2x128xf32, #tpu.memory_space<vmem>>, vector<2x128xf32>
    %c0_1 = arith.constant 0 : index
    %c0_2 = arith.constant 0 : index
    %1 = vector.load %arg2[%c0_1, %c0_2] : memref<128x8xf32, #tpu.memory_space<vmem>>, vector<128x8xf32>
    %cst = arith.constant dense<0.000000e+00> : vector<2x8xf32>
    %2 = tpu.matmul %0, %1, %cst {dimension_numbers = #tpu.dot_dimension_numbers<[1], [0], [0], [1], [0, 0, 1, 1], [], []>} : vector<2x128xf32>, vector<128x8xf32>, vector<2x8xf32> -> vector<2x8xf32>
    %c0_3 = arith.constant 0 : index
    %c0_4 = arith.constant 0 : index
    %3 = vector.load %arg3[%c0_3, %c0_4] : memref<1x8xf32, #tpu.memory_space<vmem>>, vector<1x8xf32>
    %4 = vector.broadcast %3 : vector<1x8xf32> to vector<2x8xf32>
    %5 = arith.addf %2, %4 : vector<2x8xf32>
    %6 = arith.negf %5 : vector<2x8xf32>
    %7 = math.exp %6 : vector<2x8xf32>
    %cst_5 = arith.constant 1.000000e+00 : f32
    %8 = vector.broadcast %cst_5 : f32 to vector<2x8xf32>
    %9 = arith.addf %8, %7 : vector<2x8xf32>
    %10 = arith.divf %8, %9 : vector<2x8xf32>
    %c0_6 = arith.constant 0 : index
    %c0_7 = arith.constant 0 : index
    %11 = vector.load %arg4[%c0_6, %c0_7] : memref<2x8xf32, #tpu.memory_space<vmem>>, vector<2x8xf32>
    tpu.vector_store %arg4[%c0_6, %c0_7], %10 {strides = array<i32>} : memref<2x8xf32, #tpu.memory_space<vmem>>, vector<2x8xf32>,
    return
  }
  func.func @transform_0(%arg0: i32) -> (i32, i32) {
    %c0_i32 = arith.constant 0 : i32
    %c0_i32_0 = arith.constant 0 : i32
    return %arg0, %c0_i32 : i32, i32
  }
  func.func @transform_1(%arg0: i32) -> (i32, i32) {
    %c0_i32 = arith.constant 0 : i32
    %c0_i32_0 = arith.constant 0 : i32
    %c0_i32_1 = arith.constant 0 : i32
    return %c0_i32, %c0_i32_0 : i32, i32
  }
  func.func @transform_2(%arg0: i32) -> (i32, i32) {
    %c0_i32 = arith.constant 0 : i32
    %c0_i32_0 = arith.constant 0 : i32
    %c0_i32_1 = arith.constant 0 : i32
    return %c0_i32, %c0_i32_0 : i32, i32
  }
  func.func @transform_3(%arg0: i32) -> (i32, i32) {
    %c0_i32 = arith.constant 0 : i32
    %c0_i32_0 = arith.constant 0 : i32
    return %arg0, %c0_i32 : i32, i32
  }
}

</mosaic_0001>

<bundles_post_ra>
// kernel: reward_model_forward.1
= control target key start
LH: loop header
LB: loop body
LE: loop exit
PB: predicated region body
PF: predicated region fallthrough
CT: control target
= control target key end

     0   :  { %v205_v0 = vmov 0.0|0.0   ;;  %vm206_vm0 = vmmov 0   ;;  %v207_v4 = vmov 0.0   ;;  %vm114_vm1 = vcmask 58368   ;;  %s285_s1 = inlined_call_operand.vmem [shape: f32[128,8], index: 1, kind: input, shape index: {}]   ;;  %s286_s0 = inlined_call_operand.vmem [shape: f32[2,128], index: 0, kind: input, shape index: {}]   ;;  %s287_s2 = inlined_call_operand.vmem [shape: f32[1,8], index: 2, kind: input, shape index: {}]   ;;  %s288_s3 = inlined_call_operand.vmem [shape: f32[2,8], index: 3, kind: output, shape index: {}]  }
   0x1   :  { %174 = vmatprep.subr.bf16.mxu0 %v205_v0  ;;  %v15_v1 = vld [vmem:[%s285_s1] sm:$0xff]  ;;  %v16_v2 = vld [vmem:[%s285_s1 + $0x8] sm:$0xff]  ;;  %v17_v3 = vld [vmem:[%s285_s1 + $0x10] sm:$0xff]  ;;  %171 = vmatprep.mubr.msk.f32.mxu0 %vm206_vm0, %v207_v4 }
   0x2   :  { %v175_v5 = vpack.c.bf16 %v16_v2, %v15_v1  ;;  %v18_v6 = vld [vmem:[%s285_s1 + $0x18] sm:$0xff]  ;;  %v19_v8 = vld [vmem:[%s285_s1 + $0x20] sm:$0xff]  ;;  %v20_v9 = vld [vmem:[%s285_s1 + $0x28] sm:$0xff] }
   0x3   :  { %v178_v7 = vpack.c.bf16 %v18_v6, %v17_v3  ;;  %v181_v10 = vpack.c.bf16 %v20_v9, %v19_v8  ;;  %v21_v11 = vld [vmem:[%s285_s1 + $0x30] sm:$0xff]  ;;  %v22_v12 = vld [vmem:[%s285_s1 + $0x38] sm:$0xff]  ;;  %v23_v14 = vld [vmem:[%s285_s1 + $0x40] sm:$0xff] }
   0x4   :  { %176 = vmatpush3.bf16.msra.mxu0 %v175_v5  ;;  %v184_v13 = vpack.c.bf16 %v22_v12, %v21_v11  ;;  %v24_v15 = vld [vmem:[%s285_s1 + $0x48] sm:$0xff]  ;;  %v25_v17 = vld [vmem:[%s285_s1 + $0x50] sm:$0xff]  ;;  %v26_v18 = vld [vmem:[%s285_s1 + $0x58] sm:$0xff] }
   0x5   :  { %177 = vmatprep.subr.bf16.mxu0 %v205_v0  ;;  %v187_v16 = vpack.c.bf16 %v24_v15, %v23_v14  ;;  %v190_v19 = vpack.c.bf16 %v26_v18, %v25_v17  ;;  %v27_v20 = vld [vmem:[%s285_s1 + $0x60] sm:$0xff]  ;;  %v28_v21 = vld [vmem:[%s285_s1 + $0x68] sm:$0xff]  ;;  %v29_v23 = vld [vmem:[%s285_s1 + $0x70] sm:$0xff] }
   0x6   :  { %v193_v22 = vpack.c.bf16 %v28_v21, %v27_v20  ;;  %v30_v24 = vld [vmem:[%s285_s1 + $0x78] sm:$0xff]  ;;  %v14_v26 = vld [vmem:[%s286_s0] sm:$0x3] }
   0x7   :  { %v196_v25 = vpack.c.bf16 %v30_v24, %v29_v23  ;;  %v120_v27 = vld [vmem:[%s287_s2] ss:$0 sm:$0xff] }
   0x8   :  { %179 = vmatpush3.bf16.msra.mxu0 %v178_v7 }
   0x9   :  { %180 = vmatprep.subr.bf16.mxu0 %v205_v0 }
   0xc   :  { %182 = vmatpush3.bf16.msra.mxu0 %v181_v10 }
   0xd   :  { %183 = vmatprep.subr.bf16.mxu0 %v205_v0 }
  0x10   :  { %185 = vmatpush3.bf16.msra.mxu0 %v184_v13 }
  0x11   :  { %186 = vmatprep.subr.bf16.mxu0 %v205_v0 }
  0x14   :  { %188 = vmatpush3.bf16.msra.mxu0 %v187_v16 }
  0x15   :  { %189 = vmatprep.subr.bf16.mxu0 %v205_v0 }
  0x18   :  { %191 = vmatpush3.bf16.msra.mxu0 %v190_v19 }
  0x19   :  { %192 = vmatprep.subr.bf16.mxu0 %v205_v0 }
  0x1c   :  { %194 = vmatpush3.bf16.msra.mxu0 %v193_v22 }
  0x1d   :  { %195 = vmatprep.subr.bf16.mxu0 %v205_v0 }
  0x20   :  { %197 = vmatpush3.bf16.msra.mxu0 %v196_v25 }
  0x23   :  { %172 = vmatmul.mubr.f32.vlgmr.msra.gmra.mrb[0].mxu0 %v14_v26 }
  0xf6   :  { %v104_v28 = vpop.f32.mrb[0].mxu0 }
  0xf7   :  { %v105_v29 = vadd.f32 %v120_v27, %v104_v28  ;;  %v173_v30 = vpop.f32.mrb[1].mxu0 }
  0xf9   :  { %v121_v31 = vmul.f32 -1.442695, %v105_v29 }
  0xfb   :  { %201 = vpow2.f32 %v121_v31 }
 0x105   :  { %v202_v32 = vpop.eup %201 }
 0x106   :  { %v111_v33 = vadd.f32 1.0, %v202_v32 }
 0x108   :  { %203 = vrcp.f32 %v111_v33 }
 0x112   :  { %v204_v34 = vpop.eup %203 }
 0x113   :  { %115 = vst.msk [vmem:[%s288_s3] sm:$0x3] %vm114_vm1, %v204_v34 }

</bundles_post_ra>
